<compile_context>
chip_gen: v7x
topology: tpu7x:2x2x1
jax: 0.10.0
libtpu: 0.0.40
codegen_flags: <defaults>
</compile_context>

<pallas_src>
import functools

import jax
import jax.numpy as jnp
from jax.experimental import pallas as pl
from jax.experimental.pallas import tpu as pltpu


_MAX_LANES = 1024                    # preferred lane-dense last dim
_TARGET_TILE_BYTES = 4 * 1024 * 1024  # ~4 MiB input tile per grid step


def _scalar_kernel(x_ref, o_ref, *, r, s):
    # r, s are Python floats baked in at trace time (module constants).
    # Weak-typed scalars keep the compute in x's native dtype (exact for f32,
    # native bf16 VALU on v6e/v7x).  Op is HBM-bandwidth bound; VPU has slack.
    # TODO(synk): integer input dtypes would need explicit float round-trip +
    # rounding to match torch semantics; float dtypes assumed here.
    o_ref[...] = ((x_ref[...] + r) * s).astype(o_ref.dtype)


def _round_up(n, m):
    return -(-n // m) * m


@functools.partial(jax.jit, static_argnums=(1, 2))
def simples_scalar(x: jax.Array, r: float, s: float) -> jax.Array:
    """(x + r) * s elementwise, via a tiled, lane-dense Pallas TPU kernel."""
    orig_shape = x.shape
    total = x.size
    itemsize = x.dtype.itemsize

    # Pick a lane-dense last dim that divides the element count if possible
    # (avoids any padding for typical NN sizes); fall back to a tiny pad.
    lanes = _MAX_LANES
    while lanes > 128 and total % lanes != 0:
        lanes //= 2

    flat = x.reshape(-1)
    padded_total = _round_up(total, lanes)
    if padded_total != total:
        # Rare path: pad at most (lanes - 1) elements (<= 4 KiB), not a tile.
        flat = jnp.pad(flat, (0, padded_total - total))
    rows = padded_total // lanes
    x2 = flat.reshape(rows, lanes)

    # Rows per tile: ~4 MiB tiles, multiple of 8 sublanes; ensure >= 2 grid
    # steps when rows allow so v7x's two TensorCores both stream.
    if rows < 8:
        tm = rows                                   # tiny input: full extent
    else:
        max_tm = max(8, (_TARGET_TILE_BYTES // (lanes * itemsize)) // 8 * 8)
        tm = min(max_tm, _round_up(pl.cdiv(rows, 2), 8))
    grid = (pl.cdiv(rows, tm),)                     # partial last block is OK:
                                                    # writes masked, elementwise

    kernel = functools.partial(_scalar_kernel, r=float(r), s=float(s))

    y2 = pl.pallas_call(
        kernel,
        out_shape=jax.ShapeDtypeStruct((rows, lanes), x.dtype),
        grid=grid,
        in_specs=[pl.BlockSpec((tm, lanes), lambda i: (i, 0))],
        out_specs=pl.BlockSpec((tm, lanes), lambda i: (i, 0)),
        compiler_params=pltpu.CompilerParams(
            dimension_semantics=("parallel",),      # megacore split on v7x
            vmem_limit_bytes=32 * 1024 * 1024,      # 2 bufs x (in+out) x 4 MiB
        ),
        cost_estimate=pl.CostEstimate(
            flops=2 * total,
            transcendentals=0,
            bytes_accessed=2 * total * itemsize,
        ),
    )(x2)

    y_flat = y2.reshape(-1)
    if padded_total != total:
        y_flat = y_flat[:total]
    return y_flat.reshape(orig_shape)


if __name__ == "__main__":
    # Module params (scalars baked into the nn.Module): r and s.
    r, s = 3.0, 2.0

    # Deterministic input consistent with the module (NCHW, small).
    key = jax.random.PRNGKey(0)
    x = jax.random.uniform(key, (2, 4, 16, 16), dtype=jnp.float32)

    y = simples_scalar(x, r, s)
    jax.block_until_ready(y)

    y_ref = (x + r) * s
    assert y.shape == x.shape and y.dtype == x.dtype
    assert jnp.allclose(y, y_ref, atol=1e-6, rtol=1e-6), "mismatch vs reference"

    # Also exercise the non-divisible (padding) path with the spec's literal
    # 1x1x5x5 input shape.
    x_small = jnp.asarray(
        [[[[0.7576, 0.2793, 0.4031, 0.7347, 0.0293],
           [0.7999, 0.3971, 0.7544, 0.5695, 0.4388],
           [0.6387, 0.5247, 0.6826, 0.3051, 0.4635],
           [0.4550, 0.5725, 0.4980, 0.9371, 0.6556],
           [0.3138, 0.1980, 0.4162, 0.2843, 0.3398]]]],
        dtype=jnp.float32,
    )
    y_small = simples_scalar(x_small, r, s)
    jax.block_until_ready(y_small)
    assert jnp.allclose(y_small, (x_small + r) * s, atol=1e-6, rtol=1e-6)

    print("KERNEL_OK")
</pallas_src>

<mosaic_0001>
module attributes {stable_mosaic.version = 11 : i64} {
  func.func @_scalar_kernel(%arg0: i32, %arg1: memref<2x1024xf32, #tpu.memory_space<vmem>>, %arg2: memref<2x1024xf32, #tpu.memory_space<vmem>>) attributes {dimension_semantics = [#tpu.dimension_semantics<parallel>], iteration_bounds = array<i64: 1>, scalar_prefetch = 0 : i64, scratch_operands = 0 : i64, tpu.core_type = #tpu.core_type<tc>, window_params = [{transform_indices = @transform_0, window_bounds = array<i64: 2, 1024>}, {transform_indices = @transform_1, window_bounds = array<i64: 2, 1024>}]} {
    %c0 = arith.constant 0 : index
    %c0_0 = arith.constant 0 : index
    %0 = vector.load %arg1[%c0, %c0_0] : memref<2x1024xf32, #tpu.memory_space<vmem>>, vector<2x1024xf32>
    %cst = arith.constant 3.000000e+00 : f32
    %1 = vector.broadcast %cst : f32 to vector<2x1024xf32>
    %2 = arith.addf %0, %1 : vector<2x1024xf32>
    %cst_1 = arith.constant 2.000000e+00 : f32
    %3 = vector.broadcast %cst_1 : f32 to vector<2x1024xf32>
    %4 = arith.mulf %2, %3 : vector<2x1024xf32>
    %c0_2 = arith.constant 0 : index
    %c0_3 = arith.constant 0 : index
    %5 = vector.load %arg2[%c0_2, %c0_3] : memref<2x1024xf32, #tpu.memory_space<vmem>>, vector<2x1024xf32>
    tpu.vector_store %arg2[%c0_2, %c0_3], %4 {strides = array<i32>} : memref<2x1024xf32, #tpu.memory_space<vmem>>, vector<2x1024xf32>,
    return
  }
  func.func @transform_0(%arg0: i32) -> (i32, i32) {
    %c0_i32 = arith.constant 0 : i32
    %c0_i32_0 = arith.constant 0 : i32
    return %arg0, %c0_i32 : i32, i32
  }
  func.func @transform_1(%arg0: i32) -> (i32, i32) {
    %c0_i32 = arith.constant 0 : i32
    %c0_i32_0 = arith.constant 0 : i32
    return %arg0, %c0_i32 : i32, i32
  }
}

</mosaic_0001>

<bundles_post_ra>
// kernel: simples_scalar.1
= control target key start
LH: loop header
LB: loop body
LE: loop exit
PB: predicated region body
PF: predicated region fallthrough
CT: control target
= control target key end

     0   :  { %s42_s0 = inlined_call_operand.vmem [shape: f32[2,1024], index: 0, kind: input, shape index: {}]   ;;  %s43_s1 = inlined_call_operand.vmem [shape: f32[2,1024], index: 1, kind: output, shape index: {}]  }
   0x1   :  { %v8_v0 = vld [vmem:[%s42_s0] sm:$0xff]  ;;  %v9_v1 = vld [vmem:[%s42_s0 + $0x8] sm:$0xff] }
   0x2   :  { %v10_v2 = vadd.f32 3.0, %v8_v0  ;;  %v11_v3 = vadd.f32 3.0, %v9_v1 }
   0x4   :  { %v12_v4 = vmul.f32 2.0, %v10_v2  ;;  %v13_v5 = vmul.f32 2.0, %v11_v3 }
   0x6   :  { %14 = vst [vmem:[%s43_s1] sm:$0xff] %v12_v4  ;;  %15 = vst [vmem:[%s43_s1 + $0x8] sm:$0xff] %v13_v5 }

</bundles_post_ra>
